<compile_context>
chip_gen: v7x
topology: tpu7x:2x2x1
jax: 0.10.0
libtpu: 0.0.40
codegen_flags: <defaults>
</compile_context>

<pallas_src>
import jax
import jax.numpy as jnp
from jax.experimental import pallas as pl
from jax.experimental.pallas import tpu as pltpu


def _normalize_kernel(x_ref, stats_ref, o_ref):
    # x_ref / o_ref : (r, lane_tile) tiles of the flattened (N*C, H*W) tensor.
    # stats_ref     : (r, 2) f32, column 0 = scale (=1/std), column 1 = bias (=-mean/std).
    s = stats_ref[...]
    scale = s[:, 0:1]                      # (r, 1) -> VPU lane broadcast
    bias = s[:, 1:2]
    xf = x_ref[...].astype(jnp.float32)    # elementwise math in f32, cast at the store
    o_ref[...] = (xf * scale + bias).astype(o_ref.dtype)


def _round_up(x: int, m: int) -> int:
    return (x + m - 1) // m * m


def my_normalize(x: jax.Array, mean: jax.Array, var: jax.Array) -> jax.Array:
    """(x - mean) / sqrt(var); mean/var are per-channel (C,) broadcast over N,H,W."""
    N, C, H, W = x.shape
    dtype = x.dtype
    dtype_bytes = jnp.dtype(dtype).itemsize

    rows = N * C          # one row per (n, c) plane
    lanes = H * W         # lane-dense spatial extent

    # Per-channel scale/bias in f32 (out = x*scale + bias == (x - mean)/sqrt(var)).
    # TODO(synk): no epsilon before the sqrt, matching the PyTorch module exactly.
    inv_std = 1.0 / jnp.sqrt(var.astype(jnp.float32))
    scale_rows = jnp.tile(inv_std, N)                               # row i -> channel i % C
    bias_rows = jnp.tile(-mean.astype(jnp.float32) * inv_std, N)
    stats = jnp.stack([scale_rows, bias_rows], axis=1)              # (rows, 2) f32, tiny

    x_flat = x.reshape(rows, lanes)        # contiguous reshape: free, no extra HBM pass

    # ---- generation-aware tiling budgets --------------------------------------------
    vmem_cap = 64 << 20                    # conservative (v7x-sized) fallback
    try:
        vmem_cap = int(pltpu.get_tpu_info().vmem_capacity_bytes)
    except Exception:
        pass
    if vmem_cap >= (128 << 20):            # v5e / v6e: 128 MiB VMEM -> bigger tiles
        target_bytes = 8 << 20
        vmem_limit = 64 << 20
        lane_tile_cap = 16384
    else:                                  # v7x (64 MiB VMEM) or unknown
        target_bytes = 4 << 20
        vmem_limit = 40 << 20
        lane_tile_cap = 8192

    sublane = max(8, 32 // dtype_bytes)    # 8 rows f32 / 16 bf16 / 32 int8-fp8 per vreg

    # Lane tiling: full (possibly non-128-multiple) last dim when one sublane-row-group
    # of it fits the budget; otherwise 128-multiple chunks (ragged final chunk is masked).
    if sublane * lanes * dtype_bytes <= target_bytes:
        lane_tile = lanes                  # block dim == full array dim: always legal
    else:
        lane_tile = min(lanes, lane_tile_cap)
    n_lane = pl.cdiv(lanes, lane_tile)

    # Row tiling: biggest sublane-multiple tile keeping one buffer near target_bytes.
    r = max(sublane, (target_bytes // (lane_tile * dtype_bytes * sublane)) * sublane)
    if r >= rows:
        r = rows                           # full dim -> legal regardless of divisibility
    n_row = pl.cdiv(rows, r)

    # Give the two v7x TensorCores something to split when the grid would be one step.
    if n_row * n_lane == 1 and rows > sublane:
        r_half = _round_up(pl.cdiv(rows, 2), sublane)
        if r_half < rows:
            r = r_half
            n_row = pl.cdiv(rows, r)

    cost = pl.CostEstimate(
        flops=2 * rows * lanes,
        transcendentals=0,
        bytes_accessed=2 * rows * lanes * dtype_bytes + rows * 2 * 4,
    )

    out_flat = pl.pallas_call(
        _normalize_kernel,
        out_shape=jax.ShapeDtypeStruct((rows, lanes), dtype),
        grid=(n_row, n_lane),
        in_specs=[
            pl.BlockSpec((r, lane_tile), lambda i, j: (i, j)),
            # Constant in j -> the tiny stat block is not re-fetched across lane tiles.
            pl.BlockSpec((r, 2), lambda i, j: (i, 0)),
        ],
        out_specs=pl.BlockSpec((r, lane_tile), lambda i, j: (i, j)),
        compiler_params=pltpu.CompilerParams(
            dimension_semantics=("parallel", "parallel"),  # independent tiles -> megacore
            vmem_limit_bytes=vmem_limit,
        ),
        cost_estimate=cost,
    )(x_flat, stats)

    return out_flat.reshape(N, C, H, W)


if __name__ == "__main__":
    key = jax.random.PRNGKey(0)
    kx, km, kv = jax.random.split(key, 3)

    N, C, H, W = 2, 4, 16, 16
    x = jax.random.normal(kx, (N, C, H, W), dtype=jnp.float32) * 3.0 + 1.5
    # Deterministic per-channel statistics (the module's __init__ receives mean, var).
    mean = jax.random.normal(km, (C,), dtype=jnp.float32)
    var = jax.random.uniform(kv, (C,), dtype=jnp.float32, minval=0.5, maxval=2.0)

    out = my_normalize(x, mean, var)
    out = jax.block_until_ready(out)

    # Reference (pure JAX), mirroring PyTorch broadcasting of per-channel stats.
    ref = (x - mean[None, :, None, None]) / jnp.sqrt(var)[None, :, None, None]
    assert out.shape == x.shape and out.dtype == x.dtype
    assert jnp.allclose(out, ref, atol=1e-5, rtol=1e-5)

    print("KERNEL_OK")
</pallas_src>

<mosaic_0001>
module attributes {stable_mosaic.version = 11 : i64} {
  func.func @_normalize_kernel(%arg0: i32, %arg1: i32, %arg2: memref<8x256xf32, #tpu.memory_space<vmem>>, %arg3: memref<8x2xf32, #tpu.memory_space<vmem>>, %arg4: memref<8x256xf32, #tpu.memory_space<vmem>>) attributes {dimension_semantics = [#tpu.dimension_semantics<parallel>, #tpu.dimension_semantics<parallel>], iteration_bounds = array<i64: 1, 1>, scalar_prefetch = 0 : i64, scratch_operands = 0 : i64, tpu.core_type = #tpu.core_type<tc>, window_params = [{transform_indices = @transform_0, window_bounds = array<i64: 8, 256>}, {transform_indices = @transform_1, window_bounds = array<i64: 8, 2>}, {transform_indices = @transform_2, window_bounds = array<i64: 8, 256>}]} {
    %c0 = arith.constant 0 : index
    %c0_0 = arith.constant 0 : index
    %0 = vector.load %arg3[%c0, %c0_0] : memref<8x2xf32, #tpu.memory_space<vmem>>, vector<8x2xf32>
    %1 = vector.extract_strided_slice %0 {offsets = [0, 0], sizes = [8, 1], strides = [1, 1]} : vector<8x2xf32> to vector<8x1xf32>
    %2 = vector.extract_strided_slice %0 {offsets = [0, 1], sizes = [8, 1], strides = [1, 1]} : vector<8x2xf32> to vector<8x1xf32>
    %c0_1 = arith.constant 0 : index
    %c0_2 = arith.constant 0 : index
    %3 = vector.load %arg2[%c0_1, %c0_2] : memref<8x256xf32, #tpu.memory_space<vmem>>, vector<8x256xf32>
    %4 = vector.broadcast %1 : vector<8x1xf32> to vector<8x256xf32>
    %5 = arith.mulf %3, %4 : vector<8x256xf32>
    %6 = vector.broadcast %2 : vector<8x1xf32> to vector<8x256xf32>
    %7 = arith.addf %5, %6 : vector<8x256xf32>
    %c0_3 = arith.constant 0 : index
    %c0_4 = arith.constant 0 : index
    %8 = vector.load %arg4[%c0_3, %c0_4] : memref<8x256xf32, #tpu.memory_space<vmem>>, vector<8x256xf32>
    tpu.vector_store %arg4[%c0_3, %c0_4], %7 {strides = array<i32>} : memref<8x256xf32, #tpu.memory_space<vmem>>, vector<8x256xf32>,
    return
  }
  func.func @transform_0(%arg0: i32, %arg1: i32) -> (i32, i32) {
    %c0_i32 = arith.constant 0 : i32
    return %arg0, %arg1 : i32, i32
  }
  func.func @transform_1(%arg0: i32, %arg1: i32) -> (i32, i32) {
    %c0_i32 = arith.constant 0 : i32
    %c0_i32_0 = arith.constant 0 : i32
    return %arg0, %c0_i32 : i32, i32
  }
  func.func @transform_2(%arg0: i32, %arg1: i32) -> (i32, i32) {
    %c0_i32 = arith.constant 0 : i32
    return %arg0, %arg1 : i32, i32
  }
}

</mosaic_0001>

<bundles_post_ra>
// kernel: tpu_custom_call.1
= control target key start
LH: loop header
LB: loop body
LE: loop exit
PB: predicated region body
PF: predicated region fallthrough
CT: control target
= control target key end

     0   :  { %7 = vsyncpa [#allocation3], 0  ;;  %s157_s0 = inlined_call_operand.hbm [shape: f32[8,256], index: 0, kind: input, shape index: {}]   ;;  %s158_s1 = inlined_call_operand.vmem [shape: f32[8,2], index: 1, kind: input, shape index: {}]   ;;  %s159_s2 = inlined_call_operand.hbm [shape: f32[8,256], index: 2, kind: output, shape index: {}]  }
   0x1   :  { %8 = vsyncpa [#allocation4], 0  ;;  %s111_s9 = smov [#allocation2]   ;;  %s63_s13 = scalar_lea.hbm %s157_s0, 256 }
   0x2   :  { %s15_s10 = sshll.u32 %s111_s9, 4  ;;  %p64_p0 = scmp.ne.s32.totalorder %s157_s0, %s63_s13  ;;  %s16_s10 = int_to_ptr.vmem [resolvable:$true] %s15_s10 }
   0x3   :  { %p67_p1 = scmp.lt.u32.totalorder %s63_s13, %s157_s0 }
   0x5   :  { %p69_p2 = pnand %p67_p1, %p64_p0 }
   0x7   :  { %72 = shalt.err (!%p69_p2)
}
   0x8   :  { %s73_s18 = scalar_lea.vmem %s16_s10, 256  ;;  %p78_p4 = scmp.lt.s32.totalorder %s16_s10, %s16_s10 }
   0x9   :  { %p74_p3 = scmp.ne.s32.totalorder %s16_s10, %s73_s18  ;;  %p79_p5 = scmp.lt.s32.totalorder %s73_s18, %s73_s18 }
   0xb   :  { %p80_p6 = por %p79_p5, %p78_p4 }
   0xd   :  { %p81_p7 = pnand %p80_p6, %p74_p3 }
   0xf   :  { %84 = shalt.err (!%p81_p7)
}
  0x10   :  { %18 = dma.hbm_to_vmem [thread:$0]  %s157_s0, 256, %s16_s10, [#allocation3]  }
  0x11   :  { %107 = dma.done.wait [#allocation3], 256  }
  0x12   :  { %108 = vsyncadd [#allocation3], 4294967040  ;;  %v112_v0 = vmov 0   ;;  %v24_v1 = vld [vmem:[%s158_s1] sm:$0xff]  ;;  %v113_v2 = vmov 1   ;;  %v26_v5 = vld [vmem:[#allocation2 + $0x8] sm:$0xff] }
  0x13   :  { %61 = vset.pattern.permute.xlu0 %v112_v0  ;;  %v25_v4 = vld [vmem:[#allocation2] sm:$0xff]  ;;  %s114_s23 = smov [#allocation5]  }
  0x14   :  { %29 = vperm.xlu0 %61, %v24_v1   ;;  %s48_s24 = sshll.u32 %s114_s23, 4  ;;  %s49_s24 = int_to_ptr.vmem [resolvable:$true] %s48_s24 }
  0x15   :  { %s85_s0 = scalar_lea.vmem %s49_s24, 256  ;;  %p90_p9 = scmp.lt.s32.totalorder %s49_s24, %s49_s24 }
  0x16   :  { %p86_p8 = scmp.ne.s32.totalorder %s49_s24, %s85_s0  ;;  %p91_p10 = scmp.lt.s32.totalorder %s85_s0, %s85_s0 }
  0x18   :  { %62 = vset.pattern.permute.xlu0 %v113_v2  ;;  %p92_p11 = por %p91_p10, %p90_p9 }
  0x19   :  { %35 = vperm.xlu0 %62, %v24_v1  }
  0x1a   :  { %p93_p12 = pnand %p92_p11, %p86_p8 }
  0x93   :  { %v30_v3 = vpop.permute.xlu0 %29 }
  0x94   :  { %v32_v6 = vmul.f32 %v30_v3, %v25_v4  ;;  %v33_v7 = vmul.f32 %v30_v3, %v26_v5 }
  0x98   :  { %v36_v8 = vpop.permute.xlu0 %35 }
  0x99   :  { %v38_v9 = vadd.f32 %v36_v8, %v32_v6  ;;  %v39_v10 = vadd.f32 %v36_v8, %v33_v7 }
  0x9b   :  { %40 = vst [vmem:[#allocation5] sm:$0xff] %v38_v9  ;;  %41 = vst [vmem:[#allocation5 + $0x8] sm:$0xff] %v39_v10 }
  0x9c   :  { %96 = shalt.err (!%p93_p12)
}
  0x9d   :  { %s97_s26 = scalar_lea.hbm %s159_s2, 256 }
  0x9e   :  { %p98_p13 = scmp.ne.s32.totalorder %s159_s2, %s97_s26  ;;  %p101_p0 = scmp.lt.u32.totalorder %s97_s26, %s159_s2 }
  0xa0   :  { %p103_p1 = pnand %p101_p0, %p98_p13 }
  0xa2   :  { %106 = shalt.err (!%p103_p1)
}
  0xa3   :  { %51 = dma.vmem_to_hbm [thread:$0]  %s49_s24, 256, %s159_s2, [#allocation4]  }
  0xa4   :  { %109 = dma.done.wait [#allocation4], 256  }
  0xa5   :  { %110 = vsyncadd [#allocation4], 4294967040 }
  0xa6   :  { %55 = vsyncpa [#allocation3], 1 }
  0xa7   :  { %56 = vsyncpa [#allocation4], 1 }

</bundles_post_ra>
